<compile_context>
chip_gen: v5e
topology: v5e:2x2
jax: 0.10.0
libtpu: 0.0.40
codegen_flags: <defaults>
</compile_context>

<pallas_src>
import functools

import jax
import jax.numpy as jnp
from jax.experimental import pallas as pl
from jax.experimental.pallas import tpu as pltpu

EPS = 1e-5  # PyTorch nn.LayerNorm default eps


def _layernorm(h, gamma, beta):
    mu = jnp.mean(h, axis=-1, keepdims=True)
    var = jnp.mean((h - mu) ** 2, axis=-1, keepdims=True)
    return (h - mu) * jax.lax.rsqrt(var + EPS) * gamma + beta


def actor_kernel(x_ref,
                 w1_ref, v1_ref,        # v1 = [bias1; gamma1; beta1]  (3, H) f32
                 w2_ref, v2_ref,        # v2 = [bias2; gamma2; beta2]  (3, H) f32
                 w3_ref, b3_ref,
                 out_ref,
                 *, scale, offset):
    # Activations cast to bf16 per-tile in VMEM (VPU slack); weights already bf16.
    x = x_ref[...].astype(jnp.bfloat16)                                # (Bt, S)

    # fc1 + LayerNorm + ReLU   (MXU bf16 x bf16 -> f32 accumulate)
    h1 = jnp.dot(x, w1_ref[...], preferred_element_type=jnp.float32) + v1_ref[0:1, :]
    h1 = jnp.maximum(_layernorm(h1, v1_ref[1:2, :], v1_ref[2:3, :]), 0.0)

    # fc2 + LayerNorm + ReLU
    h2 = jnp.dot(h1.astype(jnp.bfloat16), w2_ref[...],
                 preferred_element_type=jnp.float32) + v2_ref[0:1, :]
    h2 = jnp.maximum(_layernorm(h2, v2_ref[1:2, :], v2_ref[2:3, :]), 0.0)

    # continuous_output + tanh (EUP) + fused affine rescale
    raw = jnp.dot(h2.astype(jnp.bfloat16), w3_ref[...],
                  preferred_element_type=jnp.float32) + b3_ref[...]
    out_ref[...] = (offset + scale * jnp.tanh(raw)).astype(out_ref.dtype)


@functools.partial(jax.jit, static_argnames=("action_low", "action_high", "batch_tile"))
def actor_forward(state, params, *, action_low=-1.0, action_high=1.0, batch_tile=None):
    """state: (B, state_size) -> scaled_action: (B, action_size) f32."""
    B, S = state.shape
    H = params["w1"].shape[1]
    A = params["w3"].shape[1]

    # Batch tiling:
    #   * small batches: one block (no grid overhead)
    #   * large batches: up to 512-row tiles, but always >= 2 grid steps so the
    #     "parallel" axis actually shards across v7x's two TensorCores and
    #     256-row-wide MXU passes on v6e/v7x stay full.
    if batch_tile is None:
        if B <= 256:
            batch_tile = B
        else:
            half = -(-B // 2)                              # ceil(B / 2)
            batch_tile = min(512, ((half + 7) // 8) * 8)   # multiple of 8 sublanes
    grid = (pl.cdiv(B, batch_tile),)

    # Fold the action rescale: out = offset + scale * tanh(raw).
    scale = (float(action_high) - float(action_low)) * 0.5
    offset = float(action_low) + scale

    # Scoped-VMEM budget from the actual footprint (v5e default is only 16 MiB).
    itemsize = jnp.dtype(state.dtype).itemsize
    est_vmem = (2 * batch_tile * S * itemsize              # input tile, double-buffered
                + 2 * batch_tile * A * 4                   # output tile, double-buffered
                + (S * H + H * H + H * A) * 2              # bf16 weights, single-buffered
                + (6 * H + A) * 4                          # packed bias/gamma/beta + b3
                + 4 * batch_tile * H * 4)                  # f32 activation headroom
    vmem_limit = int(min(100 << 20, max(32 << 20, 2 * est_vmem)))

    kernel = functools.partial(actor_kernel, scale=scale, offset=offset)

    # Weights / LN vectors never change block index -> single-buffer them.
    resident = dict(pipeline_mode=pl.Buffered(1))

    return pl.pallas_call(
        kernel,
        out_shape=jax.ShapeDtypeStruct((B, A), jnp.float32),
        grid=grid,
        in_specs=[
            pl.BlockSpec((batch_tile, S), lambda i: (i, 0)),            # state tile
            pl.BlockSpec((S, H), lambda i: (0, 0), **resident),         # w1 (bf16)
            pl.BlockSpec((3, H), lambda i: (0, 0), **resident),         # b1/g1/be1
            pl.BlockSpec((H, H), lambda i: (0, 0), **resident),         # w2 (bf16)
            pl.BlockSpec((3, H), lambda i: (0, 0), **resident),         # b2/g2/be2
            pl.BlockSpec((H, A), lambda i: (0, 0), **resident),         # w3 (bf16)
            pl.BlockSpec((1, A), lambda i: (0, 0), **resident),         # b3
        ],
        out_specs=pl.BlockSpec((batch_tile, A), lambda i: (i, 0)),
        compiler_params=pltpu.CompilerParams(
            dimension_semantics=("parallel",),
            vmem_limit_bytes=vmem_limit,
        ),
    )(state, params["w1"], params["v1"], params["w2"], params["v2"],
      params["w3"], params["b3"])


def init_params(key, state_size, action_size, hidden_size):
    """Deterministic synthetic init (PyTorch-Linear-style uniform bounds).

    Linear weights are stored in bf16 (MXU operands); biases and LayerNorm
    affine params stay f32 (used by f32 VPU math).
    """
    ks = jax.random.split(key, 10)

    def lin(kw, kb, fan_in, fan_out):
        bound = 1.0 / jnp.sqrt(fan_in)
        w = jax.random.uniform(kw, (fan_in, fan_out), jnp.float32, -bound, bound)
        b = jax.random.uniform(kb, (1, fan_out), jnp.float32, -bound, bound)
        return w.astype(jnp.bfloat16), b

    w1, b1 = lin(ks[0], ks[1], state_size, hidden_size)
    w2, b2 = lin(ks[2], ks[3], hidden_size, hidden_size)
    w3, b3 = lin(ks[4], ks[5], hidden_size, action_size)

    # LayerNorm affine params (perturbed from defaults so the test exercises them).
    g1 = 1.0 + 0.1 * jax.random.uniform(ks[6], (1, hidden_size), jnp.float32, -1, 1)
    be1 = 0.1 * jax.random.uniform(ks[7], (1, hidden_size), jnp.float32, -1, 1)
    g2 = 1.0 + 0.1 * jax.random.uniform(ks[8], (1, hidden_size), jnp.float32, -1, 1)
    be2 = 0.1 * jax.random.uniform(ks[9], (1, hidden_size), jnp.float32, -1, 1)

    return {
        "w1": w1, "v1": jnp.concatenate([b1, g1, be1], axis=0),   # (3, H) f32
        "w2": w2, "v2": jnp.concatenate([b2, g2, be2], axis=0),   # (3, H) f32
        "w3": w3, "b3": b3,                                       # (H, A) bf16, (1, A) f32
    }


def actor_reference(state, p, *, action_low=-1.0, action_high=1.0):
    """Plain-JAX f32 reference for correctness check."""
    x = state.astype(jnp.float32)
    w1 = p["w1"].astype(jnp.float32)
    w2 = p["w2"].astype(jnp.float32)
    w3 = p["w3"].astype(jnp.float32)
    h1 = jnp.maximum(_layernorm(x @ w1 + p["v1"][0:1], p["v1"][1:2], p["v1"][2:3]), 0.0)
    h2 = jnp.maximum(_layernorm(h1 @ w2 + p["v2"][0:1], p["v2"][1:2], p["v2"][2:3]), 0.0)
    raw = h2 @ w3 + p["b3"]
    t = jnp.tanh(raw)
    return action_low + (action_high - action_low) * (t + 1.0) / 2


if __name__ == "__main__":
    batch, state_size, action_size, hidden_size = 8, 24, 8, 32
    action_low, action_high = -2.0, 2.0

    key = jax.random.PRNGKey(0)
    k_s, k_p = jax.random.split(key)
    state = jax.random.normal(k_s, (batch, state_size), jnp.float32)
    params = init_params(k_p, state_size, action_size, hidden_size)

    act = actor_forward(state, params, action_low=action_low, action_high=action_high)
    act = jax.block_until_ready(act)

    act_ref = actor_reference(state, params, action_low=action_low, action_high=action_high)
    assert act.shape == (batch, action_size)
    assert bool(jnp.all(act >= action_low - 1e-3)) and bool(jnp.all(act <= action_high + 1e-3))
    # bf16 matmul inputs (f32 accumulation) -> looser tolerance vs. the f32 reference.
    assert jnp.allclose(act, act_ref, atol=3e-2, rtol=3e-2), (act, act_ref)

    print("KERNEL_OK")
</pallas_src>

<mosaic_0001>
module attributes {stable_mosaic.version = 11 : i64} {
  func.func @actor_kernel(%arg0: i32, %arg1: memref<8x24xf32, #tpu.memory_space<vmem>>, %arg2: memref<24x32xbf16, #tpu.memory_space<vmem>>, %arg3: memref<3x32xf32, #tpu.memory_space<vmem>>, %arg4: memref<32x32xbf16, #tpu.memory_space<vmem>>, %arg5: memref<3x32xf32, #tpu.memory_space<vmem>>, %arg6: memref<32x8xbf16, #tpu.memory_space<vmem>>, %arg7: memref<1x8xf32, #tpu.memory_space<vmem>>, %arg8: memref<8x8xf32, #tpu.memory_space<vmem>>) attributes {dimension_semantics = [#tpu.dimension_semantics<parallel>], iteration_bounds = array<i64: 1>, scalar_prefetch = 0 : i64, scratch_operands = 0 : i64, tpu.core_type = #tpu.core_type<tc>, window_params = [{transform_indices = @transform_0, window_bounds = array<i64: 8, 24>}, {pipeline_mode = #tpu.pipeline_mode<synchronous>, transform_indices = @transform_1, window_bounds = array<i64: 24, 32>}, {pipeline_mode = #tpu.pipeline_mode<synchronous>, transform_indices = @transform_2, window_bounds = array<i64: 3, 32>}, {pipeline_mode = #tpu.pipeline_mode<synchronous>, transform_indices = @transform_3, window_bounds = array<i64: 32, 32>}, {pipeline_mode = #tpu.pipeline_mode<synchronous>, transform_indices = @transform_4, window_bounds = array<i64: 3, 32>}, {pipeline_mode = #tpu.pipeline_mode<synchronous>, transform_indices = @transform_5, window_bounds = array<i64: 32, 8>}, {pipeline_mode = #tpu.pipeline_mode<synchronous>, transform_indices = @transform_6, window_bounds = array<i64: 1, 8>}, {transform_indices = @transform_7, window_bounds = array<i64: 8, 8>}]} {
    %c0 = arith.constant 0 : index
    %c0_0 = arith.constant 0 : index
    %0 = vector.load %arg1[%c0, %c0_0] : memref<8x24xf32, #tpu.memory_space<vmem>>, vector<8x24xf32>
    %1 = arith.truncf %0 : vector<8x24xf32> to vector<8x24xbf16>
    %c0_1 = arith.constant 0 : index
    %c0_2 = arith.constant 0 : index
    %2 = vector.load %arg2[%c0_1, %c0_2] : memref<24x32xbf16, #tpu.memory_space<vmem>>, vector<24x32xbf16>
    %cst = arith.constant dense<0.000000e+00> : vector<8x32xf32>
    %3 = tpu.matmul %1, %2, %cst {dimension_numbers = #tpu.dot_dimension_numbers<[1], [0], [0], [1], [0, 0, 1, 1], [], []>} : vector<8x24xbf16>, vector<24x32xbf16>, vector<8x32xf32> -> vector<8x32xf32>
    %c0_3 = arith.constant 0 : index
    %c0_4 = arith.constant 0 : index
    %4 = vector.load %arg3[%c0_3, %c0_4] : memref<3x32xf32, #tpu.memory_space<vmem>>, vector<1x32xf32>
    %5 = vector.broadcast %4 : vector<1x32xf32> to vector<8x32xf32>
    %6 = arith.addf %3, %5 : vector<8x32xf32>
    %c1 = arith.constant 1 : index
    %c0_5 = arith.constant 0 : index
    %7 = vector.load %arg3[%c1, %c0_5] : memref<3x32xf32, #tpu.memory_space<vmem>>, vector<1x32xf32>
    %c2 = arith.constant 2 : index
    %c0_6 = arith.constant 0 : index
    %8 = vector.load %arg3[%c2, %c0_6] : memref<3x32xf32, #tpu.memory_space<vmem>>, vector<1x32xf32>
    %cst_7 = arith.constant dense<0.000000e+00> : vector<8xf32>
    %9 = vector.multi_reduction <add>, %6, %cst_7 [1] : vector<8x32xf32> to vector<8xf32>
    %10 = vector.shape_cast %9 : vector<8xf32> to vector<8x1xf32>
    %cst_8 = arith.constant 3.200000e+01 : f32
    %11 = vector.broadcast %cst_8 : f32 to vector<8x1xf32>
    %12 = arith.divf %10, %11 : vector<8x1xf32>
    %13 = vector.broadcast %12 : vector<8x1xf32> to vector<8x32xf32>
    %14 = arith.subf %6, %13 : vector<8x32xf32>
    %15 = arith.mulf %14, %14 : vector<8x32xf32>
    %cst_9 = arith.constant dense<0.000000e+00> : vector<8xf32>
    %16 = vector.multi_reduction <add>, %15, %cst_9 [1] : vector<8x32xf32> to vector<8xf32>
    %17 = vector.shape_cast %16 : vector<8xf32> to vector<8x1xf32>
    %cst_10 = arith.constant 3.200000e+01 : f32
    %18 = vector.broadcast %cst_10 : f32 to vector<8x1xf32>
    %19 = arith.divf %17, %18 : vector<8x1xf32>
    %20 = vector.broadcast %12 : vector<8x1xf32> to vector<8x32xf32>
    %21 = arith.subf %6, %20 : vector<8x32xf32>
    %cst_11 = arith.constant 9.99999974E-6 : f32
    %22 = vector.broadcast %cst_11 : f32 to vector<8x1xf32>
    %23 = arith.addf %19, %22 : vector<8x1xf32>
    %24 = math.rsqrt %23 : vector<8x1xf32>
    %25 = vector.broadcast %24 : vector<8x1xf32> to vector<8x32xf32>
    %26 = arith.mulf %21, %25 : vector<8x32xf32>
    %27 = vector.broadcast %7 : vector<1x32xf32> to vector<8x32xf32>
    %28 = arith.mulf %26, %27 : vector<8x32xf32>
    %29 = vector.broadcast %8 : vector<1x32xf32> to vector<8x32xf32>
    %30 = arith.addf %28, %29 : vector<8x32xf32>
    %cst_12 = arith.constant 0.000000e+00 : f32
    %31 = vector.broadcast %cst_12 : f32 to vector<8x32xf32>
    %32 = arith.maximumf %30, %31 : vector<8x32xf32>
    %33 = arith.truncf %32 : vector<8x32xf32> to vector<8x32xbf16>
    %c0_13 = arith.constant 0 : index
    %c0_14 = arith.constant 0 : index
    %34 = vector.load %arg4[%c0_13, %c0_14] : memref<32x32xbf16, #tpu.memory_space<vmem>>, vector<32x32xbf16>
    %cst_15 = arith.constant dense<0.000000e+00> : vector<8x32xf32>
    %35 = tpu.matmul %33, %34, %cst_15 {dimension_numbers = #tpu.dot_dimension_numbers<[1], [0], [0], [1], [0, 0, 1, 1], [], []>} : vector<8x32xbf16>, vector<32x32xbf16>, vector<8x32xf32> -> vector<8x32xf32>
    %c0_16 = arith.constant 0 : index
    %c0_17 = arith.constant 0 : index
    %36 = vector.load %arg5[%c0_16, %c0_17] : memref<3x32xf32, #tpu.memory_space<vmem>>, vector<1x32xf32>
    %37 = vector.broadcast %36 : vector<1x32xf32> to vector<8x32xf32>
    %38 = arith.addf %35, %37 : vector<8x32xf32>
    %c1_18 = arith.constant 1 : index
    %c0_19 = arith.constant 0 : index
    %39 = vector.load %arg5[%c1_18, %c0_19] : memref<3x32xf32, #tpu.memory_space<vmem>>, vector<1x32xf32>
    %c2_20 = arith.constant 2 : index
    %c0_21 = arith.constant 0 : index
    %40 = vector.load %arg5[%c2_20, %c0_21] : memref<3x32xf32, #tpu.memory_space<vmem>>, vector<1x32xf32>
    %cst_22 = arith.constant dense<0.000000e+00> : vector<8xf32>
    %41 = vector.multi_reduction <add>, %38, %cst_22 [1] : vector<8x32xf32> to vector<8xf32>
    %42 = vector.shape_cast %41 : vector<8xf32> to vector<8x1xf32>
    %cst_23 = arith.constant 3.200000e+01 : f32
    %43 = vector.broadcast %cst_23 : f32 to vector<8x1xf32>
    %44 = arith.divf %42, %43 : vector<8x1xf32>
    %45 = vector.broadcast %44 : vector<8x1xf32> to vector<8x32xf32>
    %46 = arith.subf %38, %45 : vector<8x32xf32>
    %47 = arith.mulf %46, %46 : vector<8x32xf32>
    %cst_24 = arith.constant dense<0.000000e+00> : vector<8xf32>
    %48 = vector.multi_reduction <add>, %47, %cst_24 [1] : vector<8x32xf32> to vector<8xf32>
    %49 = vector.shape_cast %48 : vector<8xf32> to vector<8x1xf32>
    %cst_25 = arith.constant 3.200000e+01 : f32
    %50 = vector.broadcast %cst_25 : f32 to vector<8x1xf32>
    %51 = arith.divf %49, %50 : vector<8x1xf32>
    %52 = vector.broadcast %44 : vector<8x1xf32> to vector<8x32xf32>
    %53 = arith.subf %38, %52 : vector<8x32xf32>
    %cst_26 = arith.constant 9.99999974E-6 : f32
    %54 = vector.broadcast %cst_26 : f32 to vector<8x1xf32>
    %55 = arith.addf %51, %54 : vector<8x1xf32>
    %56 = math.rsqrt %55 : vector<8x1xf32>
    %57 = vector.broadcast %56 : vector<8x1xf32> to vector<8x32xf32>
    %58 = arith.mulf %53, %57 : vector<8x32xf32>
    %59 = vector.broadcast %39 : vector<1x32xf32> to vector<8x32xf32>
    %60 = arith.mulf %58, %59 : vector<8x32xf32>
    %61 = vector.broadcast %40 : vector<1x32xf32> to vector<8x32xf32>
    %62 = arith.addf %60, %61 : vector<8x32xf32>
    %cst_27 = arith.constant 0.000000e+00 : f32
    %63 = vector.broadcast %cst_27 : f32 to vector<8x32xf32>
    %64 = arith.maximumf %62, %63 : vector<8x32xf32>
    %65 = arith.truncf %64 : vector<8x32xf32> to vector<8x32xbf16>
    %c0_28 = arith.constant 0 : index
    %c0_29 = arith.constant 0 : index
    %66 = vector.load %arg6[%c0_28, %c0_29] : memref<32x8xbf16, #tpu.memory_space<vmem>>, vector<32x8xbf16>
    %cst_30 = arith.constant dense<0.000000e+00> : vector<8x8xf32>
    %67 = tpu.matmul %65, %66, %cst_30 {dimension_numbers = #tpu.dot_dimension_numbers<[1], [0], [0], [1], [0, 0, 1, 1], [], []>} : vector<8x32xbf16>, vector<32x8xbf16>, vector<8x8xf32> -> vector<8x8xf32>
    %c0_31 = arith.constant 0 : index
    %c0_32 = arith.constant 0 : index
    %68 = vector.load %arg7[%c0_31, %c0_32] : memref<1x8xf32, #tpu.memory_space<vmem>>, vector<1x8xf32>
    %69 = vector.broadcast %68 : vector<1x8xf32> to vector<8x8xf32>
    %70 = arith.addf %67, %69 : vector<8x8xf32>
    %71 = math.tanh %70 : vector<8x8xf32>
    %cst_33 = arith.constant 2.000000e+00 : f32
    %72 = vector.broadcast %cst_33 : f32 to vector<8x8xf32>
    %73 = arith.mulf %72, %71 : vector<8x8xf32>
    %cst_34 = arith.constant 0.000000e+00 : f32
    %74 = vector.broadcast %cst_34 : f32 to vector<8x8xf32>
    %75 = arith.addf %74, %73 : vector<8x8xf32>
    %c0_35 = arith.constant 0 : index
    %c0_36 = arith.constant 0 : index
    %76 = vector.load %arg8[%c0_35, %c0_36] : memref<8x8xf32, #tpu.memory_space<vmem>>, vector<8x8xf32>
    tpu.vector_store %arg8[%c0_35, %c0_36], %75 {strides = array<i32>} : memref<8x8xf32, #tpu.memory_space<vmem>>, vector<8x8xf32>,
    return
  }
  func.func @transform_0(%arg0: i32) -> (i32, i32) {
    %c0_i32 = arith.constant 0 : i32
    %c0_i32_0 = arith.constant 0 : i32
    return %arg0, %c0_i32 : i32, i32
  }
  func.func @transform_1(%arg0: i32) -> (i32, i32) {
    %c0_i32 = arith.constant 0 : i32
    %c0_i32_0 = arith.constant 0 : i32
    %c0_i32_1 = arith.constant 0 : i32
    return %c0_i32, %c0_i32_0 : i32, i32
  }
  func.func @transform_2(%arg0: i32) -> (i32, i32) {
    %c0_i32 = arith.constant 0 : i32
    %c0_i32_0 = arith.constant 0 : i32
    %c0_i32_1 = arith.constant 0 : i32
    return %c0_i32, %c0_i32_0 : i32, i32
  }
  func.func @transform_3(%arg0: i32) -> (i32, i32) {
    %c0_i32 = arith.constant 0 : i32
    %c0_i32_0 = arith.constant 0 : i32
    %c0_i32_1 = arith.constant 0 : i32
    return %c0_i32, %c0_i32_0 : i32, i32
  }
  func.func @transform_4(%arg0: i32) -> (i32, i32) {
    %c0_i32 = arith.constant 0 : i32
    %c0_i32_0 = arith.constant 0 : i32
    %c0_i32_1 = arith.constant 0 : i32
    return %c0_i32, %c0_i32_0 : i32, i32
  }
  func.func @transform_5(%arg0: i32) -> (i32, i32) {
    %c0_i32 = arith.constant 0 : i32
    %c0_i32_0 = arith.constant 0 : i32
    %c0_i32_1 = arith.constant 0 : i32
    return %c0_i32, %c0_i32_0 : i32, i32
  }
  func.func @transform_6(%arg0: i32) -> (i32, i32) {
    %c0_i32 = arith.constant 0 : i32
    %c0_i32_0 = arith.constant 0 : i32
    %c0_i32_1 = arith.constant 0 : i32
    return %c0_i32, %c0_i32_0 : i32, i32
  }
  func.func @transform_7(%arg0: i32) -> (i32, i32) {
    %c0_i32 = arith.constant 0 : i32
    %c0_i32_0 = arith.constant 0 : i32
    return %arg0, %c0_i32 : i32, i32
  }
}

</mosaic_0001>

<bundles_post_ra>
// kernel: actor_forward.1
= control target key start
LH: loop header
LB: loop body
LE: loop exit
PB: predicated region body
PF: predicated region fallthrough
CT: control target
= control target key end

     0   :  { %12 = vsyncpa [#allocation3], 0  ;;  %s510_s0 = inlined_call_operand.hbm [shape: f32[8,24], index: 0, kind: input, shape index: {}]   ;;  %s511_s1 = inlined_call_operand.hbm [shape: bf16[24,32], index: 1, kind: input, shape index: {}]   ;;  %s512_s2 = inlined_call_operand.vmem [shape: f32[3,32], index: 2, kind: input, shape index: {}]   ;;  %s513_s3 = inlined_call_operand.vmem [shape: bf16[32,32], index: 3, kind: input, shape index: {}]   ;;  %s514_s4 = inlined_call_operand.hbm [shape: f32[3,32], index: 4, kind: input, shape index: {}]   ;;  %s515_s5 = inlined_call_operand.vmem [shape: bf16[32,8], index: 5, kind: input, shape index: {}]   ;;  %s516_s6 = inlined_call_operand.vmem [shape: f32[1,8], index: 6, kind: input, shape index: {}]   ;;  %s517_s7 = inlined_call_operand.hbm [shape: f32[8,8], index: 7, kind: output, shape index: {}]  }
   0x1   :  { %13 = vsyncpa [#allocation6], 0  ;;  %s30_s26 = sshll.u32 %s511_s1, 4  ;;  %s31_s26 = int_to_ptr.hbm [resolvable:$true] %s30_s26 }
   0x2   :  { %14 = vsyncpa [#allocation4], 0  ;;  %s421_s27 = smov [#allocation5]   ;;  %s20_s8 = sshll.u32 %s510_s0, 4  ;;  %s21_s8 = int_to_ptr.hbm [resolvable:$true] %s20_s8 }
   0x3   :  { %s32_s28 = sshll.u32 %s421_s27, 4  ;;  %s422_s9 = smov 64   ;;  %s33_s28 = int_to_ptr.vmem [resolvable:$true] %s32_s28 }
   0x4   :  { %s423_s10 = smov 4   ;;  %s424_s11 = smov [#allocation2]  }
   0x5   :  { %38 = dma.hbm_to_vmem [thread:$0]  %s31_s26, 192, %s33_s28, [#allocation6], %s422_s9, %s422_s9, %s423_s10  }
   0x6   :  { %s22_s12 = sshll.u32 %s424_s11, 4  ;;  %s48_s15 = sshll.u32 %s514_s4, 4  ;;  %s23_s12 = int_to_ptr.vmem [resolvable:$true] %s22_s12  ;;  %s49_s15 = int_to_ptr.hbm [resolvable:$true] %s48_s15 }
   0x7   :  { %25 = dma.hbm_to_vmem [thread:$0]  %s21_s8, 128, %s23_s12, [#allocation3]  }
   0x8   :  { %s425_s1 = smov [#allocation7]  }
   0x9   :  { %s50_s16 = sshll.u32 %s425_s1, 4  ;;  %s51_s16 = int_to_ptr.vmem [resolvable:$true] %s50_s16 }
   0xa   :  { %53 = dma.hbm_to_vmem [thread:$0]  %s49_s15, 64, %s51_s16, [#allocation6]  }
   0xb   :  { %415 = dma.done.wait [#allocation3], 128  }
   0xc   :  { %416 = vsyncadd [#allocation3], 4294967168 }
   0xd   :  { %417 = dma.done.wait [#allocation6], 256  }
   0xe   :  { %418 = vsyncadd [#allocation6], 4294967040  ;;  %v75_v0 = vld [vmem:[#allocation5 + $0x8] sm:$0xf]  ;;  %vm91_vm0 = vcmask 1043456   ;;  %v292_v4 = vld [vmem:[#allocation5] sm:$0xff] }
   0xf   :  { %v83_v1 = vunpack.c.l.b16 %v75_v0  ;;  %v71_v5 = vld [vmem:[#allocation2] sm:$0xff]  ;;  %vm87_vm1 = vcmask 195584   ;;  %vm110_vm2 = vcmask 261120   ;;  %v426_v12 = vmov 32.0   ;;  %v294_v24 = vld [vmem:[%s513_s3 + $0x8] sm:$0xff]  ;;  %s427_s28 = smov [#allocation8]  }
  0x10   :  { %v72_v6 = vpack.c.bf16 %v71_v5, %v71_v5  ;;  %v304_v7 = vld [vmem:[%s512_s2] ss:$0 sm:$0xff]  ;;  %311 = vrcp.f32 %v426_v12  ;;  %173 = vmatpush.bf16.msra.mxu1 %v294_v24  ;;  %v305_v35 = vld [vmem:[%s512_s2 + $0x1] ss:$0 sm:$0xff]  ;;  %v306_v38 = vld [vmem:[%s512_s2 + $0x2] ss:$0 sm:$0xff] }
  0x11   :  { %v85_v2 = vpack.c.b16 %v83_v1, %v83_v1  ;;  %v293_v25 = vld [vmem:[%s513_s3] sm:$0xff]  ;;  %v307_v43 = vld [vmem:[#allocation7] ss:$0 sm:$0xff]  ;;  %v296_v53 = vld [vmem:[%s515_s5 + $0x8] sm:$0xff]  ;;  %s256_s29 = sshll.u32 %s427_s28, 4  ;;  %s258_s9 = sshll.u32 %s517_s7, 4  ;;  %s257_s29 = int_to_ptr.vmem [resolvable:$true] %s256_s29  ;;  %s259_s9 = int_to_ptr.hbm [resolvable:$true] %s258_s9 }
  0x12   :  { %239 = vmatpush.bf16.msra.mxu2 %v296_v53  ;;  %v295_v54 = vld [vmem:[%s515_s5] sm:$0xff]  ;;  %v308_v0 = vld [vmem:[#allocation7 + $0x1] ss:$0 sm:$0xff]  ;;  %vm249_vm10 = vcmask 64512  }
  0x13   :  { %v93_v3 = vsel %vm91_vm0, %v85_v2, 0 }
  0x14   :  { %101 = vmatpush.bf16.msra.mxu0 %v93_v3  ;;  %174 = vmatpush.bf16.msra.mxu1 %v293_v25  ;;  %v309_v3 = vld [vmem:[#allocation7 + $0x2] ss:$0 sm:$0xff] }
  0x16   :  { %v312_v13 = vpop.eup %311  ;;  %240 = vmatpush.bf16.msra.mxu2 %v295_v54 }
  0x17   :  { %v115_v14 = vmul.f32 32.0, %v312_v13  ;;  %vm119_vm3 = vweird.f32 %v312_v13 }
  0x18   :  { %102 = vmatpush.bf16.msra.mxu0 %v292_v4 }
  0x19   :  { %v116_v15 = vsub.f32 1.0, %v115_v14 }
  0x1b   :  { %273 = vmatmul.msk.bf16.vlgmr.msra.gmra.mxu0 %vm87_vm1, %v72_v6  ;;  %v117_v16 = vmul.f32 %v312_v13, %v116_v15 }
  0x1d   :  { %v118_v17 = vadd.f32 %v312_v13, %v117_v16 }
  0x1f   :  { %v120_v18 = vsel %vm119_vm3, %v312_v13, %v118_v17 }
  0x98   :  { %v104_v8 = vpop.f32.mrf.mxu0 }
  0x99   :  { %v105_v9 = vadd.f32 %v304_v7, %v104_v8  ;;  %v310_v8 = vld [vmem:[%s516_s6] ss:$0 sm:$0xff] }
  0x9b   :  { %v111_v10 = vsel %vm110_vm2, %v105_v9, 0.0 }
  0x9c   :  { %112 = vadd.xlane.f32.xlu0 %v111_v10 }
  0xa0   :  { %v106_v11 = vpop.f32.mrf.mxu0 }
 0x10f   :  { %v113_v19 = vpop.xlane.xlu0 %112 }
 0x110   :  { %v121_v20 = vmul.f32 %v120_v18, %v113_v19 }
 0x112   :  { %v122_v21 = vsub.f32 %v105_v9, %v121_v20 }
 0x114   :  { %v123_v22 = vmul.f32 %v122_v21, %v122_v21 }
 0x116   :  { %v124_v23 = vsel %vm110_vm2, %v123_v22, 0.0 }
 0x117   :  { %125 = vadd.xlane.f32.xlu0 %v124_v23 }
 0x18a   :  { %v126_v26 = vpop.xlane.xlu0 %125 }
 0x18b   :  { %v127_v27 = vmul.f32 %v126_v26, %v120_v18 }
 0x18d   :  { %v128_v28 = vadd.f32 1e-05, %v127_v27 }
 0x18f   :  { %313 = vrsqrt.f32 %v128_v28  ;;  %vm135_vm5 = vweird.f32 %v128_v28 }
 0x195   :  { %v314_v29 = vpop.eup %313 }
 0x196   :  { %v130_v30 = vmul.f32 %v314_v29, %v128_v28  ;;  %vm136_vm4 = vweird.f32 %v314_v29 }
 0x197   :  { %vm137_vm6 = vmor %vm135_vm5, %vm136_vm4 }
 0x198   :  { %v131_v31 = vmul.f32 %v314_v29, %v130_v30 }
 0x19a   :  { %v132_v32 = vmul.f32 0.5, %v131_v31 }
 0x19c   :  { %v133_v33 = vsub.f32 1.5, %v132_v32 }
 0x19e   :  { %v134_v34 = vmul.f32 %v314_v29, %v133_v33 }
 0x1a0   :  { %v138_v36 = vsel %vm137_vm6, %v314_v29, %v134_v34 }
 0x1a1   :  { %v139_v37 = vmul.f32 %v138_v36, %v122_v21 }
 0x1a3   :  { %v141_v39 = vmul.f32 %v305_v35, %v139_v37 }
 0x1a5   :  { %v143_v40 = vadd.f32 %v306_v38, %v141_v39 }
 0x1a7   :  { %v144_v41 = vmax.f32 %v143_v40, 0.0 }
 0x1a9   :  { %v145_v42 = vpack.c.bf16 %v144_v41, %v144_v41 }
 0x1ab   :  { %282 = vmatmul.msk.bf16.vlgmr.msra.gmra.mxu1 %vm110_vm2, %v145_v42 }
 0x228   :  { %v176_v44 = vpop.f32.mrf.mxu1 }
 0x229   :  { %v177_v45 = vadd.f32 %v307_v43, %v176_v44 }
 0x22b   :  { %v182_v46 = vsel %vm110_vm2, %v177_v45, 0.0 }
 0x22c   :  { %183 = vadd.xlane.f32.xlu1 %v182_v46 }
 0x230   :  { %v178_v47 = vpop.f32.mrf.mxu1 }
 0x29f   :  { %v184_v48 = vpop.xlane.xlu1 %183 }
 0x2a0   :  { %v185_v49 = vmul.f32 %v184_v48, %v120_v18 }
 0x2a2   :  { %v186_v50 = vsub.f32 %v177_v45, %v185_v49 }
 0x2a4   :  { %v187_v51 = vmul.f32 %v186_v50, %v186_v50 }
 0x2a6   :  { %v188_v52 = vsel %vm110_vm2, %v187_v51, 0.0 }
 0x2a7   :  { %189 = vadd.xlane.f32.xlu1 %v188_v52 }
 0x31a   :  { %v190_v55 = vpop.xlane.xlu1 %189 }
 0x31b   :  { %v191_v56 = vmul.f32 %v190_v55, %v120_v18 }
 0x31d   :  { %v192_v57 = vadd.f32 1e-05, %v191_v56 }
 0x31f   :  { %315 = vrsqrt.f32 %v192_v57  ;;  %vm199_vm8 = vweird.f32 %v192_v57 }
 0x325   :  { %v316_v58 = vpop.eup %315 }
 0x326   :  { %v194_v59 = vmul.f32 %v316_v58, %v192_v57  ;;  %vm200_vm7 = vweird.f32 %v316_v58 }
 0x327   :  { %vm201_vm9 = vmor %vm199_vm8, %vm200_vm7 }
 0x328   :  { %v195_v60 = vmul.f32 %v316_v58, %v194_v59 }
 0x32a   :  { %v196_v61 = vmul.f32 0.5, %v195_v60 }
 0x32c   :  { %v197_v62 = vsub.f32 1.5, %v196_v61 }
 0x32e   :  { %v198_v63 = vmul.f32 %v316_v58, %v197_v62 }
 0x330   :  { %v202_v1 = vsel %vm201_vm9, %v316_v58, %v198_v63 }
 0x331   :  { %v203_v2 = vmul.f32 %v202_v1, %v186_v50 }
 0x333   :  { %v205_v4 = vmul.f32 %v308_v0, %v203_v2 }
 0x335   :  { %v207_v5 = vadd.f32 %v309_v3, %v205_v4 }
 0x337   :  { %v208_v6 = vmax.f32 %v207_v5, 0.0 }
 0x339   :  { %v209_v7 = vpack.c.bf16 %v208_v6, %v208_v6 }
 0x33b   :  { %291 = vmatmul.msk.bf16.vlgmr.msra.gmra.mxu2 %vm110_vm2, %v209_v7 }
 0x3be   :  { %v242_v9 = vpop.f32.mrf.mxu2 }
 0x3bf   :  { %v243_v10 = vadd.f32 %v310_v8, %v242_v9 }
 0x3c1   :  { %317 = vtanh.f32 %v243_v10 }
 0x3c6   :  { %v244_v11 = vpop.f32.mrf.mxu2 }
 0x3c7   :  { %v318_v12 = vpop.eup %317 }
 0x3c8   :  { %v247_v13 = vmul.f32 2.0, %v318_v12 }
 0x3ca   :  { %250 = vst.msk [vmem:[#allocation8] sm:$0xff] %vm249_vm10, %v247_v13 }
 0x3cb   :  { %261 = dma.vmem_to_hbm [thread:$0]  %s257_s29, 128, %s259_s9, [#allocation4]  }
 0x3cc   :  { %419 = dma.done.wait [#allocation4], 128  }
 0x3cd   :  { %420 = vsyncadd [#allocation4], 4294967168 }
 0x3ce   :  { %266 = vsyncpa [#allocation3], 1 }
 0x3cf   :  { %267 = vsyncpa [#allocation6], 1 }
 0x3d0   :  { %268 = vsyncpa [#allocation4], 1 }

</bundles_post_ra>
